<compile_context>
chip_gen: v7x
topology: tpu7x:2x2x1
jax: 0.10.0
libtpu: 0.0.40
codegen_flags: <defaults>
</compile_context>

<pallas_src>
import functools

import jax
import jax.numpy as jnp
from jax.experimental import pallas as pl
from jax.experimental.pallas import tpu as pltpu


def _round_up(x, m):
    return ((x + m - 1) // m) * m


def _usad_kernel(alpha, beta, h4, inv_w,
                 x_ref,
                 ew1, eb1, ew2, eb2, ew3, eb3,
                 dw1c, db1c,
                 d1w2, d1b2, d1w3, d1b3,
                 d2w2, d2b2, d2w3, d2b3,
                 z_ref, score_ref):
    x = x_ref[...].astype(jnp.float32)

    def linear(v, w_ref, b_ref):
        w = w_ref[...]
        # Cast activations to the weight dtype (no-op for f32, enables bf16 MXU
        # path when weights are stored in bf16); accumulate in f32.
        return (jnp.dot(v.astype(w.dtype), w, preferred_element_type=jnp.float32)
                + b_ref[...].astype(jnp.float32))

    # ---- Encoder: w -> w/2 -> w/4 -> z, ReLU after every layer ----
    h = jnp.maximum(linear(x, ew1, eb1), 0.0)
    h = jnp.maximum(linear(h, ew2, eb2), 0.0)
    z = jnp.maximum(linear(h, ew3, eb3), 0.0)

    # ---- Decoders: first layers share input z -> fused into one MXU matmul ----
    h12 = jnp.maximum(linear(z, dw1c, db1c), 0.0)
    h1 = h12[:, :h4]
    h2 = h12[:, h4:]

    h1 = jnp.maximum(linear(h1, d1w2, d1b2), 0.0)
    w1 = jax.nn.sigmoid(linear(h1, d1w3, d1b3))

    h2 = jnp.maximum(linear(h2, d2w2, d2b2), 0.0)
    w2 = jax.nn.sigmoid(linear(h2, d2w3, d2b3))

    # w3 = decoder2(encoder(w1)) is computed by the PyTorch forward but never
    # feeds the returned outputs; it is a dead value, so it is omitted here.

    # Single fused cross-lane reduction for both reconstruction errors:
    #   score = alpha*mean((x-w1)^2) + beta*mean((x-w2)^2)
    e1 = x - w1
    e2 = x - w2
    err = alpha * e1 * e1 + beta * e2 * e2
    score = jnp.sum(err, axis=1, keepdims=True) * inv_w

    z_ref[...] = z.astype(z_ref.dtype)
    score_ref[...] = score.astype(score_ref.dtype)


def usad_forward(x, params, alpha=0.5, beta=0.5, tile_b=256, weights_dtype=None):
    """Runs the UsadModel forward pass. Returns (z, score, None)."""
    B, w_size = x.shape
    z_size = params["encoder"][5].shape[1]  # eb3 shape (1, z_size)
    h2 = w_size // 2
    h4 = w_size // 4

    ew1, eb1, ew2, eb2, ew3, eb3 = params["encoder"]
    d1w1, d1b1, d1w2, d1b2, d1w3, d1b3 = params["decoder1"]
    d2w1, d2b1, d2w2, d2b2, d2w3, d2b3 = params["decoder2"]

    # Fuse the two decoders' first layers (same input z) into one weight matrix.
    dw1c = jnp.concatenate([d1w1, d2w1], axis=1)   # (z_size, 2*h4)
    db1c = jnp.concatenate([d1b1, d2b1], axis=1)   # (1, 2*h4)

    flat_params = [ew1, eb1, ew2, eb2, ew3, eb3,
                   dw1c, db1c,
                   d1w2, d1b2, d1w3, d1b3,
                   d2w2, d2b2, d2w3, d2b3]
    if weights_dtype is not None:
        flat_params = [p.astype(weights_dtype) for p in flat_params]

    # Batch tile: a multiple of 8 sublanes, up to tile_b rows; pad B to a multiple.
    tb = min(int(tile_b), _round_up(B, 8))
    tb = max(8, _round_up(tb, 8))
    Bp = _round_up(B, tb)
    xp = jnp.pad(x, ((0, Bp - B), (0, 0))) if Bp != B else x
    grid = (Bp // tb,)

    # VMEM budget: resident weights (+slack) + double-buffered x/z/score tiles
    # + activation slabs.  Clamp to [32 MiB, 64 MiB] (v7x VMEM is 64 MiB per TC).
    weight_bytes = sum(p.size * p.dtype.itemsize for p in flat_params)
    io_bytes = 2 * tb * (w_size + z_size + 1) * 4          # double-buffered tiles
    act_bytes = tb * (3 * w_size + 2 * h2 + 3 * h4 + z_size) * 4
    vmem_limit = int(2 * weight_bytes + 2 * io_bytes + 2 * act_bytes + (4 << 20))
    vmem_limit = max(32 * 1024 * 1024, min(vmem_limit, 64 * 1024 * 1024))

    kernel = functools.partial(_usad_kernel, float(alpha), float(beta),
                               int(h4), float(1.0 / w_size))

    x_spec = pl.BlockSpec((tb, w_size), lambda i: (i, 0))
    # Weights: full-array blocks, constant block index -> DMA'd once, not per step.
    weight_specs = [pl.BlockSpec(p.shape, lambda i: (0, 0)) for p in flat_params]

    z_pad, score_pad = pl.pallas_call(
        kernel,
        out_shape=(
            jax.ShapeDtypeStruct((Bp, z_size), jnp.float32),
            jax.ShapeDtypeStruct((Bp, 1), jnp.float32),
        ),
        grid=grid,
        in_specs=[x_spec] + weight_specs,
        out_specs=(
            pl.BlockSpec((tb, z_size), lambda i: (i, 0)),
            pl.BlockSpec((tb, 1), lambda i: (i, 0)),
        ),
        compiler_params=pltpu.CompilerParams(
            dimension_semantics=("parallel",),   # megacore sharding on v7x
            vmem_limit_bytes=vmem_limit,
        ),
    )(xp, *flat_params)

    z = z_pad[:B]
    score = score_pad[:B, 0]
    return z, score, None


def _init_linear(key, in_dim, out_dim):
    # Deterministic init mimicking PyTorch nn.Linear default: U(-1/sqrt(in), 1/sqrt(in)).
    kw, kb = jax.random.split(key)
    bound = 1.0 / jnp.sqrt(jnp.asarray(in_dim, jnp.float32))
    w = jax.random.uniform(kw, (in_dim, out_dim), jnp.float32, -bound, bound)
    b = jax.random.uniform(kb, (1, out_dim), jnp.float32, -bound, bound)
    return w, b


def init_usad_params(key, w_size, z_size):
    h2, h4 = w_size // 2, w_size // 4
    keys = jax.random.split(key, 9)

    # Encoder: w -> w/2 -> w/4 -> z
    ew1, eb1 = _init_linear(keys[0], w_size, h2)
    ew2, eb2 = _init_linear(keys[1], h2, h4)
    ew3, eb3 = _init_linear(keys[2], h4, z_size)

    # Decoder1: z -> w/4 -> w/2 -> w
    d1w1, d1b1 = _init_linear(keys[3], z_size, h4)
    d1w2, d1b2 = _init_linear(keys[4], h4, h2)
    d1w3, d1b3 = _init_linear(keys[5], h2, w_size)

    # Decoder2: z -> w/4 -> w/2 -> w
    d2w1, d2b1 = _init_linear(keys[6], z_size, h4)
    d2w2, d2b2 = _init_linear(keys[7], h4, h2)
    d2w3, d2b3 = _init_linear(keys[8], h2, w_size)

    return {
        "encoder": (ew1, eb1, ew2, eb2, ew3, eb3),
        "decoder1": (d1w1, d1b1, d1w2, d1b2, d1w3, d1b3),
        "decoder2": (d2w1, d2b1, d2w2, d2b2, d2w3, d2b3),
    }


def _reference_forward(x, params, alpha=0.5, beta=0.5):
    """Pure-JAX reference matching the PyTorch forward, for verification."""
    ew1, eb1, ew2, eb2, ew3, eb3 = params["encoder"]

    def enc(v):
        h = jax.nn.relu(v @ ew1 + eb1)
        h = jax.nn.relu(h @ ew2 + eb2)
        return jax.nn.relu(h @ ew3 + eb3)

    def dec(v, p):
        w1, b1, w2, b2, w3, b3 = p
        h = jax.nn.relu(v @ w1 + b1)
        h = jax.nn.relu(h @ w2 + b2)
        return jax.nn.sigmoid(h @ w3 + b3)

    z = enc(x)
    w1 = dec(z, params["decoder1"])
    w2 = dec(z, params["decoder2"])
    score = (alpha * jnp.mean((x - w1) ** 2, axis=1)
             + beta * jnp.mean((x - w2) ** 2, axis=1))
    return z, score


if __name__ == "__main__":
    W_SIZE, Z_SIZE = 128, 32

    key = jax.random.PRNGKey(0)
    kx, kp = jax.random.split(key)
    params = init_usad_params(kp, W_SIZE, Z_SIZE)

    # Case 1: B = 8 (exact tile, no padding).
    x8 = jax.random.normal(kx, (8, W_SIZE), jnp.float32)
    z, score, other = usad_forward(x8, params)
    jax.block_until_ready((z, score))
    z_ref, score_ref = _reference_forward(x8, params)
    assert z.shape == (8, Z_SIZE) and score.shape == (8,) and other is None
    assert jnp.allclose(z, z_ref, atol=1e-5, rtol=1e-5)
    assert jnp.allclose(score, score_ref, atol=1e-5, rtol=1e-5)

    # Case 2: B = 10 (exercises the batch-padding path).
    x10 = jax.random.normal(jax.random.PRNGKey(1), (10, W_SIZE), jnp.float32)
    z2, score2, _ = usad_forward(x10, params)
    jax.block_until_ready((z2, score2))
    z2_ref, score2_ref = _reference_forward(x10, params)
    assert z2.shape == (10, Z_SIZE) and score2.shape == (10,)
    assert jnp.allclose(z2, z2_ref, atol=1e-5, rtol=1e-5)
    assert jnp.allclose(score2, score2_ref, atol=1e-5, rtol=1e-5)

    print("KERNEL_OK")
</pallas_src>

<mosaic_0001>
module attributes {stable_mosaic.version = 11 : i64} {
  func.func @_usad_kernel(%arg0: i32, %arg1: memref<8x128xf32, #tpu.memory_space<vmem>>, %arg2: memref<128x64xf32, #tpu.memory_space<vmem>>, %arg3: memref<1x64xf32, #tpu.memory_space<vmem>>, %arg4: memref<64x32xf32, #tpu.memory_space<vmem>>, %arg5: memref<1x32xf32, #tpu.memory_space<vmem>>, %arg6: memref<32x32xf32, #tpu.memory_space<vmem>>, %arg7: memref<1x32xf32, #tpu.memory_space<vmem>>, %arg8: memref<32x64xf32, #tpu.memory_space<vmem>>, %arg9: memref<1x64xf32, #tpu.memory_space<vmem>>, %arg10: memref<32x64xf32, #tpu.memory_space<vmem>>, %arg11: memref<1x64xf32, #tpu.memory_space<vmem>>, %arg12: memref<64x128xf32, #tpu.memory_space<vmem>>, %arg13: memref<1x128xf32, #tpu.memory_space<vmem>>, %arg14: memref<32x64xf32, #tpu.memory_space<vmem>>, %arg15: memref<1x64xf32, #tpu.memory_space<vmem>>, %arg16: memref<64x128xf32, #tpu.memory_space<vmem>>, %arg17: memref<1x128xf32, #tpu.memory_space<vmem>>, %arg18: memref<8x32xf32, #tpu.memory_space<vmem>>, %arg19: memref<8x1xf32, #tpu.memory_space<vmem>>) attributes {dimension_semantics = [#tpu.dimension_semantics<parallel>], iteration_bounds = array<i64: 1>, scalar_prefetch = 0 : i64, scratch_operands = 0 : i64, tpu.core_type = #tpu.core_type<tc>, window_params = [{transform_indices = @transform_0, window_bounds = array<i64: 8, 128>}, {pipeline_mode = #tpu.pipeline_mode<synchronous>, transform_indices = @transform_1, window_bounds = array<i64: 128, 64>}, {pipeline_mode = #tpu.pipeline_mode<synchronous>, transform_indices = @transform_2, window_bounds = array<i64: 1, 64>}, {pipeline_mode = #tpu.pipeline_mode<synchronous>, transform_indices = @transform_3, window_bounds = array<i64: 64, 32>}, {pipeline_mode = #tpu.pipeline_mode<synchronous>, transform_indices = @transform_4, window_bounds = array<i64: 1, 32>}, {pipeline_mode = #tpu.pipeline_mode<synchronous>, transform_indices = @transform_5, window_bounds = array<i64: 32, 32>}, {pipeline_mode = #tpu.pipeline_mode<synchronous>, transform_indices = @transform_6, window_bounds = array<i64: 1, 32>}, {pipeline_mode = #tpu.pipeline_mode<synchronous>, transform_indices = @transform_7, window_bounds = array<i64: 32, 64>}, {pipeline_mode = #tpu.pipeline_mode<synchronous>, transform_indices = @transform_8, window_bounds = array<i64: 1, 64>}, {pipeline_mode = #tpu.pipeline_mode<synchronous>, transform_indices = @transform_9, window_bounds = array<i64: 32, 64>}, {pipeline_mode = #tpu.pipeline_mode<synchronous>, transform_indices = @transform_10, window_bounds = array<i64: 1, 64>}, {pipeline_mode = #tpu.pipeline_mode<synchronous>, transform_indices = @transform_11, window_bounds = array<i64: 64, 128>}, {pipeline_mode = #tpu.pipeline_mode<synchronous>, transform_indices = @transform_12, window_bounds = array<i64: 1, 128>}, {pipeline_mode = #tpu.pipeline_mode<synchronous>, transform_indices = @transform_13, window_bounds = array<i64: 32, 64>}, {pipeline_mode = #tpu.pipeline_mode<synchronous>, transform_indices = @transform_14, window_bounds = array<i64: 1, 64>}, {pipeline_mode = #tpu.pipeline_mode<synchronous>, transform_indices = @transform_15, window_bounds = array<i64: 64, 128>}, {pipeline_mode = #tpu.pipeline_mode<synchronous>, transform_indices = @transform_16, window_bounds = array<i64: 1, 128>}, {transform_indices = @transform_17, window_bounds = array<i64: 8, 32>}, {transform_indices = @transform_18, window_bounds = array<i64: 8, 1>}]} {
    %c0 = arith.constant 0 : index
    %c0_0 = arith.constant 0 : index
    %0 = vector.load %arg1[%c0, %c0_0] : memref<8x128xf32, #tpu.memory_space<vmem>>, vector<8x128xf32>
    %c0_1 = arith.constant 0 : index
    %c0_2 = arith.constant 0 : index
    %1 = vector.load %arg2[%c0_1, %c0_2] : memref<128x64xf32, #tpu.memory_space<vmem>>, vector<128x64xf32>
    %cst = arith.constant dense<0.000000e+00> : vector<8x64xf32>
    %2 = tpu.matmul %0, %1, %cst {dimension_numbers = #tpu.dot_dimension_numbers<[1], [0], [0], [1], [0, 0, 1, 1], [], []>} : vector<8x128xf32>, vector<128x64xf32>, vector<8x64xf32> -> vector<8x64xf32>
    %c0_3 = arith.constant 0 : index
    %c0_4 = arith.constant 0 : index
    %3 = vector.load %arg3[%c0_3, %c0_4] : memref<1x64xf32, #tpu.memory_space<vmem>>, vector<1x64xf32>
    %4 = vector.broadcast %3 : vector<1x64xf32> to vector<8x64xf32>
    %5 = arith.addf %2, %4 : vector<8x64xf32>
    %cst_5 = arith.constant 0.000000e+00 : f32
    %6 = vector.broadcast %cst_5 : f32 to vector<8x64xf32>
    %7 = arith.maximumf %5, %6 : vector<8x64xf32>
    %c0_6 = arith.constant 0 : index
    %c0_7 = arith.constant 0 : index
    %8 = vector.load %arg4[%c0_6, %c0_7] : memref<64x32xf32, #tpu.memory_space<vmem>>, vector<64x32xf32>
    %cst_8 = arith.constant dense<0.000000e+00> : vector<8x32xf32>
    %9 = tpu.matmul %7, %8, %cst_8 {dimension_numbers = #tpu.dot_dimension_numbers<[1], [0], [0], [1], [0, 0, 1, 1], [], []>} : vector<8x64xf32>, vector<64x32xf32>, vector<8x32xf32> -> vector<8x32xf32>
    %c0_9 = arith.constant 0 : index
    %c0_10 = arith.constant 0 : index
    %10 = vector.load %arg5[%c0_9, %c0_10] : memref<1x32xf32, #tpu.memory_space<vmem>>, vector<1x32xf32>
    %11 = vector.broadcast %10 : vector<1x32xf32> to vector<8x32xf32>
    %12 = arith.addf %9, %11 : vector<8x32xf32>
    %cst_11 = arith.constant 0.000000e+00 : f32
    %13 = vector.broadcast %cst_11 : f32 to vector<8x32xf32>
    %14 = arith.maximumf %12, %13 : vector<8x32xf32>
    %c0_12 = arith.constant 0 : index
    %c0_13 = arith.constant 0 : index
    %15 = vector.load %arg6[%c0_12, %c0_13] : memref<32x32xf32, #tpu.memory_space<vmem>>, vector<32x32xf32>
    %cst_14 = arith.constant dense<0.000000e+00> : vector<8x32xf32>
    %16 = tpu.matmul %14, %15, %cst_14 {dimension_numbers = #tpu.dot_dimension_numbers<[1], [0], [0], [1], [0, 0, 1, 1], [], []>} : vector<8x32xf32>, vector<32x32xf32>, vector<8x32xf32> -> vector<8x32xf32>
    %c0_15 = arith.constant 0 : index
    %c0_16 = arith.constant 0 : index
    %17 = vector.load %arg7[%c0_15, %c0_16] : memref<1x32xf32, #tpu.memory_space<vmem>>, vector<1x32xf32>
    %18 = vector.broadcast %17 : vector<1x32xf32> to vector<8x32xf32>
    %19 = arith.addf %16, %18 : vector<8x32xf32>
    %cst_17 = arith.constant 0.000000e+00 : f32
    %20 = vector.broadcast %cst_17 : f32 to vector<8x32xf32>
    %21 = arith.maximumf %19, %20 : vector<8x32xf32>
    %c0_18 = arith.constant 0 : index
    %c0_19 = arith.constant 0 : index
    %22 = vector.load %arg8[%c0_18, %c0_19] : memref<32x64xf32, #tpu.memory_space<vmem>>, vector<32x64xf32>
    %cst_20 = arith.constant dense<0.000000e+00> : vector<8x64xf32>
    %23 = tpu.matmul %21, %22, %cst_20 {dimension_numbers = #tpu.dot_dimension_numbers<[1], [0], [0], [1], [0, 0, 1, 1], [], []>} : vector<8x32xf32>, vector<32x64xf32>, vector<8x64xf32> -> vector<8x64xf32>
    %c0_21 = arith.constant 0 : index
    %c0_22 = arith.constant 0 : index
    %24 = vector.load %arg9[%c0_21, %c0_22] : memref<1x64xf32, #tpu.memory_space<vmem>>, vector<1x64xf32>
    %25 = vector.broadcast %24 : vector<1x64xf32> to vector<8x64xf32>
    %26 = arith.addf %23, %25 : vector<8x64xf32>
    %cst_23 = arith.constant 0.000000e+00 : f32
    %27 = vector.broadcast %cst_23 : f32 to vector<8x64xf32>
    %28 = arith.maximumf %26, %27 : vector<8x64xf32>
    %29 = vector.extract_strided_slice %28 {offsets = [0, 0], sizes = [8, 32], strides = [1, 1]} : vector<8x64xf32> to vector<8x32xf32>
    %30 = vector.extract_strided_slice %28 {offsets = [0, 32], sizes = [8, 32], strides = [1, 1]} : vector<8x64xf32> to vector<8x32xf32>
    %c0_24 = arith.constant 0 : index
    %c0_25 = arith.constant 0 : index
    %31 = vector.load %arg10[%c0_24, %c0_25] : memref<32x64xf32, #tpu.memory_space<vmem>>, vector<32x64xf32>
    %cst_26 = arith.constant dense<0.000000e+00> : vector<8x64xf32>
    %32 = tpu.matmul %29, %31, %cst_26 {dimension_numbers = #tpu.dot_dimension_numbers<[1], [0], [0], [1], [0, 0, 1, 1], [], []>} : vector<8x32xf32>, vector<32x64xf32>, vector<8x64xf32> -> vector<8x64xf32>
    %c0_27 = arith.constant 0 : index
    %c0_28 = arith.constant 0 : index
    %33 = vector.load %arg11[%c0_27, %c0_28] : memref<1x64xf32, #tpu.memory_space<vmem>>, vector<1x64xf32>
    %34 = vector.broadcast %33 : vector<1x64xf32> to vector<8x64xf32>
    %35 = arith.addf %32, %34 : vector<8x64xf32>
    %cst_29 = arith.constant 0.000000e+00 : f32
    %36 = vector.broadcast %cst_29 : f32 to vector<8x64xf32>
    %37 = arith.maximumf %35, %36 : vector<8x64xf32>
    %c0_30 = arith.constant 0 : index
    %c0_31 = arith.constant 0 : index
    %38 = vector.load %arg12[%c0_30, %c0_31] : memref<64x128xf32, #tpu.memory_space<vmem>>, vector<64x128xf32>
    %cst_32 = arith.constant dense<0.000000e+00> : vector<8x128xf32>
    %39 = tpu.matmul %37, %38, %cst_32 {dimension_numbers = #tpu.dot_dimension_numbers<[1], [0], [0], [1], [0, 0, 1, 1], [], []>} : vector<8x64xf32>, vector<64x128xf32>, vector<8x128xf32> -> vector<8x128xf32>
    %c0_33 = arith.constant 0 : index
    %c0_34 = arith.constant 0 : index
    %40 = vector.load %arg13[%c0_33, %c0_34] : memref<1x128xf32, #tpu.memory_space<vmem>>, vector<1x128xf32>
    %41 = vector.broadcast %40 : vector<1x128xf32> to vector<8x128xf32>
    %42 = arith.addf %39, %41 : vector<8x128xf32>
    %43 = arith.negf %42 : vector<8x128xf32>
    %44 = math.exp %43 : vector<8x128xf32>
    %cst_35 = arith.constant 1.000000e+00 : f32
    %45 = vector.broadcast %cst_35 : f32 to vector<8x128xf32>
    %46 = arith.addf %45, %44 : vector<8x128xf32>
    %47 = arith.divf %45, %46 : vector<8x128xf32>
    %c0_36 = arith.constant 0 : index
    %c0_37 = arith.constant 0 : index
    %48 = vector.load %arg14[%c0_36, %c0_37] : memref<32x64xf32, #tpu.memory_space<vmem>>, vector<32x64xf32>
    %cst_38 = arith.constant dense<0.000000e+00> : vector<8x64xf32>
    %49 = tpu.matmul %30, %48, %cst_38 {dimension_numbers = #tpu.dot_dimension_numbers<[1], [0], [0], [1], [0, 0, 1, 1], [], []>} : vector<8x32xf32>, vector<32x64xf32>, vector<8x64xf32> -> vector<8x64xf32>
    %c0_39 = arith.constant 0 : index
    %c0_40 = arith.constant 0 : index
    %50 = vector.load %arg15[%c0_39, %c0_40] : memref<1x64xf32, #tpu.memory_space<vmem>>, vector<1x64xf32>
    %51 = vector.broadcast %50 : vector<1x64xf32> to vector<8x64xf32>
    %52 = arith.addf %49, %51 : vector<8x64xf32>
    %cst_41 = arith.constant 0.000000e+00 : f32
    %53 = vector.broadcast %cst_41 : f32 to vector<8x64xf32>
    %54 = arith.maximumf %52, %53 : vector<8x64xf32>
    %c0_42 = arith.constant 0 : index
    %c0_43 = arith.constant 0 : index
    %55 = vector.load %arg16[%c0_42, %c0_43] : memref<64x128xf32, #tpu.memory_space<vmem>>, vector<64x128xf32>
    %cst_44 = arith.constant dense<0.000000e+00> : vector<8x128xf32>
    %56 = tpu.matmul %54, %55, %cst_44 {dimension_numbers = #tpu.dot_dimension_numbers<[1], [0], [0], [1], [0, 0, 1, 1], [], []>} : vector<8x64xf32>, vector<64x128xf32>, vector<8x128xf32> -> vector<8x128xf32>
    %c0_45 = arith.constant 0 : index
    %c0_46 = arith.constant 0 : index
    %57 = vector.load %arg17[%c0_45, %c0_46] : memref<1x128xf32, #tpu.memory_space<vmem>>, vector<1x128xf32>
    %58 = vector.broadcast %57 : vector<1x128xf32> to vector<8x128xf32>
    %59 = arith.addf %56, %58 : vector<8x128xf32>
    %60 = arith.negf %59 : vector<8x128xf32>
    %61 = math.exp %60 : vector<8x128xf32>
    %cst_47 = arith.constant 1.000000e+00 : f32
    %62 = vector.broadcast %cst_47 : f32 to vector<8x128xf32>
    %63 = arith.addf %62, %61 : vector<8x128xf32>
    %64 = arith.divf %62, %63 : vector<8x128xf32>
    %65 = arith.subf %0, %47 : vector<8x128xf32>
    %66 = arith.subf %0, %64 : vector<8x128xf32>
    %cst_48 = arith.constant 5.000000e-01 : f32
    %67 = vector.broadcast %cst_48 : f32 to vector<8x128xf32>
    %68 = arith.mulf %67, %65 : vector<8x128xf32>
    %69 = arith.mulf %68, %65 : vector<8x128xf32>
    %cst_49 = arith.constant 5.000000e-01 : f32
    %70 = vector.broadcast %cst_49 : f32 to vector<8x128xf32>
    %71 = arith.mulf %70, %66 : vector<8x128xf32>
    %72 = arith.mulf %71, %66 : vector<8x128xf32>
    %73 = arith.addf %69, %72 : vector<8x128xf32>
    %cst_50 = arith.constant dense<0.000000e+00> : vector<8xf32>
    %74 = vector.multi_reduction <add>, %73, %cst_50 [1] : vector<8x128xf32> to vector<8xf32>
    %75 = vector.shape_cast %74 : vector<8xf32> to vector<8x1xf32>
    %cst_51 = arith.constant 7.812500e-03 : f32
    %76 = vector.broadcast %cst_51 : f32 to vector<8x1xf32>
    %77 = arith.mulf %75, %76 : vector<8x1xf32>
    %c0_52 = arith.constant 0 : index
    %c0_53 = arith.constant 0 : index
    %78 = vector.load %arg18[%c0_52, %c0_53] : memref<8x32xf32, #tpu.memory_space<vmem>>, vector<8x32xf32>
    tpu.vector_store %arg18[%c0_52, %c0_53], %21 {strides = array<i32>} : memref<8x32xf32, #tpu.memory_space<vmem>>, vector<8x32xf32>,
    %c0_54 = arith.constant 0 : index
    %c0_55 = arith.constant 0 : index
    %79 = vector.load %arg19[%c0_54, %c0_55] : memref<8x1xf32, #tpu.memory_space<vmem>>, vector<8x1xf32>
    tpu.vector_store %arg19[%c0_54, %c0_55], %77 {strides = array<i32>} : memref<8x1xf32, #tpu.memory_space<vmem>>, vector<8x1xf32>,
    return
  }
  func.func @transform_0(%arg0: i32) -> (i32, i32) {
    %c0_i32 = arith.constant 0 : i32
    %c0_i32_0 = arith.constant 0 : i32
    return %arg0, %c0_i32 : i32, i32
  }
  func.func @transform_1(%arg0: i32) -> (i32, i32) {
    %c0_i32 = arith.constant 0 : i32
    %c0_i32_0 = arith.constant 0 : i32
    %c0_i32_1 = arith.constant 0 : i32
    return %c0_i32, %c0_i32_0 : i32, i32
  }
  func.func @transform_2(%arg0: i32) -> (i32, i32) {
    %c0_i32 = arith.constant 0 : i32
    %c0_i32_0 = arith.constant 0 : i32
    %c0_i32_1 = arith.constant 0 : i32
    return %c0_i32, %c0_i32_0 : i32, i32
  }
  func.func @transform_3(%arg0: i32) -> (i32, i32) {
    %c0_i32 = arith.constant 0 : i32
    %c0_i32_0 = arith.constant 0 : i32
    %c0_i32_1 = arith.constant 0 : i32
    return %c0_i32, %c0_i32_0 : i32, i32
  }
  func.func @transform_4(%arg0: i32) -> (i32, i32) {
    %c0_i32 = arith.constant 0 : i32
    %c0_i32_0 = arith.constant 0 : i32
    %c0_i32_1 = arith.constant 0 : i32
    return %c0_i32, %c0_i32_0 : i32, i32
  }
  func.func @transform_5(%arg0: i32) -> (i32, i32) {
    %c0_i32 = arith.constant 0 : i32
    %c0_i32_0 = arith.constant 0 : i32
    %c0_i32_1 = arith.constant 0 : i32
    return %c0_i32, %c0_i32_0 : i32, i32
  }
  func.func @transform_6(%arg0: i32) -> (i32, i32) {
    %c0_i32 = arith.constant 0 : i32
    %c0_i32_0 = arith.constant 0 : i32
    %c0_i32_1 = arith.constant 0 : i32
    return %c0_i32, %c0_i32_0 : i32, i32
  }
  func.func @transform_7(%arg0: i32) -> (i32, i32) {
    %c0_i32 = arith.constant 0 : i32
    %c0_i32_0 = arith.constant 0 : i32
    %c0_i32_1 = arith.constant 0 : i32
    return %c0_i32, %c0_i32_0 : i32, i32
  }
  func.func @transform_8(%arg0: i32) -> (i32, i32) {
    %c0_i32 = arith.constant 0 : i32
    %c0_i32_0 = arith.constant 0 : i32
    %c0_i32_1 = arith.constant 0 : i32
    return %c0_i32, %c0_i32_0 : i32, i32
  }
  func.func @transform_9(%arg0: i32) -> (i32, i32) {
    %c0_i32 = arith.constant 0 : i32
    %c0_i32_0 = arith.constant 0 : i32
    %c0_i32_1 = arith.constant 0 : i32
    return %c0_i32, %c0_i32_0 : i32, i32
  }
  func.func @transform_10(%arg0: i32) -> (i32, i32) {
    %c0_i32 = arith.constant 0 : i32
    %c0_i32_0 = arith.constant 0 : i32
    %c0_i32_1 = arith.constant 0 : i32
    return %c0_i32, %c0_i32_0 : i32, i32
  }
  func.func @transform_11(%arg0: i32) -> (i32, i32) {
    %c0_i32 = arith.constant 0 : i32
    %c0_i32_0 = arith.constant 0 : i32
    %c0_i32_1 = arith.constant 0 : i32
    return %c0_i32, %c0_i32_0 : i32, i32
  }
  func.func @transform_12(%arg0: i32) -> (i32, i32) {
    %c0_i32 = arith.constant 0 : i32
    %c0_i32_0 = arith.constant 0 : i32
    %c0_i32_1 = arith.constant 0 : i32
    return %c0_i32, %c0_i32_0 : i32, i32
  }
  func.func @transform_13(%arg0: i32) -> (i32, i32) {
    %c0_i32 = arith.constant 0 : i32
    %c0_i32_0 = arith.constant 0 : i32
    %c0_i32_1 = arith.constant 0 : i32
    return %c0_i32, %c0_i32_0 : i32, i32
  }
  func.func @transform_14(%arg0: i32) -> (i32, i32) {
    %c0_i32 = arith.constant 0 : i32
    %c0_i32_0 = arith.constant 0 : i32
    %c0_i32_1 = arith.constant 0 : i32
    return %c0_i32, %c0_i32_0 : i32, i32
  }
  func.func @transform_15(%arg0: i32) -> (i32, i32) {
    %c0_i32 = arith.constant 0 : i32
    %c0_i32_0 = arith.constant 0 : i32
    %c0_i32_1 = arith.constant 0 : i32
    return %c0_i32, %c0_i32_0 : i32, i32
  }
  func.func @transform_16(%arg0: i32) -> (i32, i32) {
    %c0_i32 = arith.constant 0 : i32
    %c0_i32_0 = arith.constant 0 : i32
    %c0_i32_1 = arith.constant 0 : i32
    return %c0_i32, %c0_i32_0 : i32, i32
  }
  func.func @transform_17(%arg0: i32) -> (i32, i32) {
    %c0_i32 = arith.constant 0 : i32
    %c0_i32_0 = arith.constant 0 : i32
    return %arg0, %c0_i32 : i32, i32
  }
  func.func @transform_18(%arg0: i32) -> (i32, i32) {
    %c0_i32 = arith.constant 0 : i32
    %c0_i32_0 = arith.constant 0 : i32
    return %arg0, %c0_i32 : i32, i32
  }
}

</mosaic_0001>

<bundles_post_ra>
// kernel: tpu_custom_call.1
= control target key start
LH: loop header
LB: loop body
LE: loop exit
PB: predicated region body
PF: predicated region fallthrough
CT: control target
= control target key end

     0   :  { %s1650_s0 = inlined_call_operand.hbm [shape: f32[8,128], index: 0, kind: input, shape index: {}]   ;;  %s1651_s1 = inlined_call_operand.vmem [shape: f32[128,64], index: 1, kind: input, shape index: {}]   ;;  %s1652_s2 = inlined_call_operand.vmem [shape: f32[1,64], index: 2, kind: input, shape index: {}]   ;;  %s1653_s3 = inlined_call_operand.vmem [shape: f32[64,32], index: 3, kind: input, shape index: {}]   ;;  %s1654_s4 = inlined_call_operand.vmem [shape: f32[1,32], index: 4, kind: input, shape index: {}]   ;;  %s1655_s5 = inlined_call_operand.vmem [shape: f32[32,32], index: 5, kind: input, shape index: {}]   ;;  %s1656_s6 = inlined_call_operand.hbm [shape: f32[1,32], index: 6, kind: input, shape index: {}]   ;;  %s1657_s7 = inlined_call_operand.vmem [shape: f32[32,64], index: 7, kind: input, shape index: {}]   ;;  %s1658_s8 = inlined_call_operand.hbm [shape: f32[1,64], index: 8, kind: input, shape index: {}]   ;;  %s1659_s9 = inlined_call_operand.vmem [shape: f32[32,64], index: 9, kind: input, shape index: {}]   ;;  %s1660_s10 = inlined_call_operand.vmem [shape: f32[1,64], index: 10, kind: input, shape index: {}]   ;;  %s1661_s11 = inlined_call_operand.vmem [shape: f32[64,128], index: 11, kind: input, shape index: {}]   ;;  %s1662_s12 = inlined_call_operand.vmem [shape: f32[1,128], index: 12, kind: input, shape index: {}]   ;;  %s1663_s13 = inlined_call_operand.vmem [shape: f32[32,64], index: 13, kind: input, shape index: {}]   ;;  %s1664_s14 = inlined_call_operand.vmem [shape: f32[1,64], index: 14, kind: input, shape index: {}]   ;;  %s1665_s15 = inlined_call_operand.vmem [shape: f32[64,128], index: 15, kind: input, shape index: {}]   ;;  %s1666_s16 = inlined_call_operand.vmem [shape: f32[1,128], index: 16, kind: input, shape index: {}]   ;;  %s1667_s17 = inlined_call_operand.hbm [shape: f32[8,32], index: 17, kind: output, shape index: {0}]   ;;  %s1668_s18 = inlined_call_operand.vmem [shape: f32[8,1], index: 18, kind: output, shape index: {1}]  }
   0x1   :  { %1671 = sst [smem:[#allocation12_spill]] %s1650_s0 }
   0x2   :  { %1672 = sst [smem:[#allocation13_spill]] %s1651_s1 }
   0x3   :  { %1673 = sst [smem:[#allocation14_spill]] %s1652_s2 }
   0x4   :  { %24 = vsyncpa [#allocation3], 0 }
   0x5   :  { %25 = vsyncpa [#allocation6], 0 }
   0x6   :  { %26 = vsyncpa [#allocation4], 0  ;;  %s1253_s27 = smov [#allocation5]   ;;  %s1254_s29 = smov [#allocation2]  }
   0x7   :  { %s53_s28 = sshll.u32 %s1253_s27, 4  ;;  %s33_s30 = sshll.u32 %s1254_s29, 4  ;;  %s54_s28 = int_to_ptr.vmem [resolvable:$true] %s53_s28  ;;  %s34_s30 = int_to_ptr.vmem [resolvable:$true] %s33_s30 }
   0x8   :  { %s1159_s1 = scalar_lea.hbm %s1656_s6, 16 }
   0x9   :  { %p1160_p0 = scmp.ne.s32.totalorder %s1656_s6, %s1159_s1  ;;  %p1163_p1 = scmp.lt.u32.totalorder %s1159_s1, %s1656_s6 }
   0xb   :  { %p1165_p2 = pnand %p1163_p1, %p1160_p0 }
   0xd   :  { %1168 = shalt.err (!%p1165_p2)
}
   0xe   :  { %s1169_s23 = scalar_lea.vmem %s54_s28, 16  ;;  %s1173_s24 = scalar_lea.vmem %s54_s28, 32 }
   0xf   :  { %p1170_p3 = scmp.ne.s32.totalorder %s54_s28, %s1169_s23  ;;  %p1174_p4 = scmp.lt.s32.totalorder %s54_s28, %s54_s28 }
  0x10   :  { %p1175_p5 = scmp.lt.s32.totalorder %s1173_s24, %s1169_s23 }
  0x12   :  { %p1176_p6 = por %p1175_p5, %p1174_p4 }
  0x14   :  { %p1177_p7 = pnand %p1176_p6, %p1170_p3 }
  0x16   :  { %1180 = shalt.err (!%p1177_p7)
}
  0x17   :  { %56 = dma.hbm_to_vmem [thread:$0]  %s1656_s6, 16, %s54_s28, [#allocation6]  }
  0x18   :  { %s1674_s0 = sld [smem:[#allocation12_spill]] }
  0x1e   :  { %s1181_s19 = scalar_lea.hbm %s1674_s0, 128 }
  0x1f   :  { %p1182_p8 = scmp.ne.s32.totalorder %s1674_s0, %s1181_s19  ;;  %p1185_p9 = scmp.lt.u32.totalorder %s1181_s19, %s1674_s0 }
  0x21   :  { %p1187_p10 = pnand %p1185_p9, %p1182_p8 }
  0x23   :  { %1190 = shalt.err (!%p1187_p10)
}
  0x24   :  { %s1191_s2 = scalar_lea.vmem %s34_s30, 128  ;;  %p1196_p12 = scmp.lt.s32.totalorder %s34_s30, %s34_s30 }
  0x25   :  { %p1192_p11 = scmp.ne.s32.totalorder %s34_s30, %s1191_s2  ;;  %p1197_p13 = scmp.lt.s32.totalorder %s1191_s2, %s1191_s2 }
  0x27   :  { %p1198_p0 = por %p1197_p13, %p1196_p12 }
  0x29   :  { %p1199_p1 = pnand %p1198_p0, %p1192_p11 }
  0x2b   :  { %1202 = shalt.err (!%p1199_p1)
}
  0x2c   :  { %36 = dma.hbm_to_vmem [thread:$0]  %s1674_s0, 128, %s34_s30, [#allocation3]  }
  0x2d   :  { %s1255_s23 = smov [#allocation7]   ;;  %s1203_s27 = scalar_lea.hbm %s1658_s8, 16 }
  0x2e   :  { %s65_s24 = sshll.u32 %s1255_s23, 4  ;;  %p1204_p2 = scmp.ne.s32.totalorder %s1658_s8, %s1203_s27  ;;  %s66_s24 = int_to_ptr.vmem [resolvable:$true] %s65_s24 }
  0x2f   :  { %p1207_p3 = scmp.lt.u32.totalorder %s1203_s27, %s1658_s8 }
  0x31   :  { %p1209_p4 = pnand %p1207_p3, %p1204_p2 }
  0x33   :  { %1212 = shalt.err (!%p1209_p4)
}
  0x34   :  { %s1213_s21 = scalar_lea.vmem %s66_s24, 16  ;;  %s1217_s30 = scalar_lea.vmem %s66_s24, 32 }
  0x35   :  { %p1214_p5 = scmp.ne.s32.totalorder %s66_s24, %s1213_s21  ;;  %p1218_p6 = scmp.lt.s32.totalorder %s66_s24, %s66_s24 }
  0x36   :  { %p1219_p7 = scmp.lt.s32.totalorder %s1217_s30, %s1213_s21 }
  0x38   :  { %p1220_p8 = por %p1219_p7, %p1218_p6 }
  0x3a   :  { %p1221_p9 = pnand %p1220_p8, %p1214_p5 }
  0x3c   :  { %1224 = shalt.err (!%p1221_p9)
}
  0x3d   :  { %68 = dma.hbm_to_vmem [thread:$0]  %s1658_s8, 16, %s66_s24, [#allocation6]  }
  0x3e   :  { %1247 = dma.done.wait [#allocation3], 128  }
  0x3f   :  { %1248 = vsyncadd [#allocation3], 4294967168 }
  0x40   :  { %1249 = dma.done.wait [#allocation6], 32  }
  0x41   :  { %1250 = vsyncadd [#allocation6], 4294967264  ;;  %v1256_v0 = vmov 0.0|0.0   ;;  %vm1257_vm0 = vmmov 0   ;;  %v1258_v1 = vmov 0.0   ;;  %s1675_s8 = sld [smem:[#allocation13_spill]] }
  0x42   :  { %1059 = vmatprep.subr.bf16.mxu0 %v1256_v0  ;;  %955 = vmatprep.mubr.msk.f32.mxu0 %vm1257_vm0, %v1258_v1  ;;  %v189_v10 = vld [vmem:[%s1653_s3] sm:$0xff]  ;;  %v190_v11 = vld [vmem:[%s1653_s3 + $0x8] sm:$0xff]  ;;  %v191_v12 = vld [vmem:[%s1653_s3 + $0x10] sm:$0xff]  ;;  %s1676_s6 = sld [smem:[#allocation14_spill]]  ;;  %vm204_vm1 = vcmask 523264   ;;  %vm290_vm2 = vcmask 261120  }
  0x43   :  { %1083 = vmatprep.subr.bf16.mxu1 %v1256_v0  ;;  %974 = vmatprep.mubr.msk.f32.mxu1 %vm1257_vm0, %v1258_v1  ;;  %v192_v13 = vld [vmem:[%s1653_s3 + $0x18] sm:$0xff]  ;;  %v1084_v15 = vpack.c.bf16 %v190_v11, %v189_v10  ;;  %v193_v19 = vld [vmem:[%s1653_s3 + $0x20] sm:$0xff]  ;;  %v194_v20 = vld [vmem:[%s1653_s3 + $0x28] sm:$0xff] }
  0x44   :  { %v1087_v18 = vpack.c.bf16 %v192_v13, %v191_v12  ;;  %v1090_v24 = vpack.c.bf16 %v194_v20, %v193_v19  ;;  %v1474_v35 = vld [vmem:[#allocation2] sm:$0xff]  ;;  %v195_v36 = vld [vmem:[%s1653_s3 + $0x30] sm:$0xff]  ;;  %v196_v37 = vld [vmem:[%s1653_s3 + $0x38] sm:$0xff] }
  0x45   :  { %1085 = vmatpush3.bf16.msra.mxu1 %v1084_v15  ;;  %v1093_v38 = vpack.c.bf16 %v196_v37, %v195_v36  ;;  %v279_v40 = vld [vmem:[%s1655_s5] sm:$0xff]  ;;  %v280_v41 = vld [vmem:[%s1655_s5 + $0x8] sm:$0xff]  ;;  %v281_v47 = vld [vmem:[%s1655_s5 + $0x10] sm:$0xff] }
  0x46   :  { %1086 = vmatprep.subr.bf16.mxu1 %v1256_v0  ;;  %v1096_v45 = vpack.c.bf16 %v280_v41, %v279_v40  ;;  %v282_v48 = vld [vmem:[%s1655_s5 + $0x18] sm:$0xff]  ;;  %v843_v50 = vld [vmem:[%s1654_s4] ss:$0 sm:$0xff]  ;;  %v366_v52 = vld [vmem:[%s1657_s7 + $0x8] sm:$0xff] }
  0x47   :  { %v95_v2 = vld [vmem:[%s1675_s8] sm:$0xff]  ;;  %v96_v3 = vld [vmem:[%s1675_s8 + $0x8] sm:$0xff]  ;;  %v97_v4 = vld [vmem:[%s1675_s8 + $0x10] sm:$0xff]  ;;  %v1099_v49 = vpack.c.bf16 %v282_v48, %v281_v47 }
  0x48   :  { %v1060_v5 = vpack.c.bf16 %v96_v3, %v95_v2  ;;  %v98_v6 = vld [vmem:[%s1675_s8 + $0x18] sm:$0xff]  ;;  %v99_v8 = vld [vmem:[%s1675_s8 + $0x20] sm:$0xff]  ;;  %v100_v9 = vld [vmem:[%s1675_s8 + $0x28] sm:$0xff] }
  0x49   :  { %v1063_v7 = vpack.c.bf16 %v98_v6, %v97_v4  ;;  %v1066_v14 = vpack.c.bf16 %v100_v9, %v99_v8  ;;  %v101_v16 = vld [vmem:[%s1675_s8 + $0x30] sm:$0xff]  ;;  %v102_v17 = vld [vmem:[%s1675_s8 + $0x38] sm:$0xff]  ;;  %v103_v22 = vld [vmem:[%s1675_s8 + $0x40] sm:$0xff]  ;;  %1088 = vmatpush3.bf16.msra.mxu1 %v1087_v18 }
  0x4a   :  { %1061 = vmatpush3.bf16.msra.mxu0 %v1060_v5  ;;  %v1069_v21 = vpack.c.bf16 %v102_v17, %v101_v16  ;;  %v104_v23 = vld [vmem:[%s1675_s8 + $0x48] sm:$0xff]  ;;  %1089 = vmatprep.subr.bf16.mxu1 %v1256_v0  ;;  %v105_v26 = vld [vmem:[%s1675_s8 + $0x50] sm:$0xff]  ;;  %v106_v27 = vld [vmem:[%s1675_s8 + $0x58] sm:$0xff] }
  0x4b   :  { %1062 = vmatprep.subr.bf16.mxu0 %v1256_v0  ;;  %v1072_v25 = vpack.c.bf16 %v104_v23, %v103_v22  ;;  %v1075_v28 = vpack.c.bf16 %v106_v27, %v105_v26  ;;  %v107_v29 = vld [vmem:[%s1675_s8 + $0x60] sm:$0xff]  ;;  %v108_v30 = vld [vmem:[%s1675_s8 + $0x68] sm:$0xff]  ;;  %v109_v32 = vld [vmem:[%s1675_s8 + $0x70] sm:$0xff] }
  0x4c   :  { %v1078_v31 = vpack.c.bf16 %v108_v30, %v107_v29  ;;  %v110_v33 = vld [vmem:[%s1675_s8 + $0x78] sm:$0xff]  ;;  %v842_v39 = vld [vmem:[%s1676_s6] ss:$0 sm:$0xff]  ;;  %v367_v58 = vld [vmem:[%s1657_s7 + $0x10] sm:$0xff]  ;;  %s1259_s6 = smov 96  }
  0x4d   :  { %1091 = vmatpush3.bf16.msra.mxu1 %v1090_v24  ;;  %v1081_v34 = vpack.c.bf16 %v110_v33, %v109_v32  ;;  %v365_v51 = vld [vmem:[%s1657_s7] sm:$0xff]  ;;  %v368_v59 = vld [vmem:[%s1657_s7 + $0x18] sm:$0xff]  ;;  %v845_v61 = vld [vmem:[#allocation5] ss:$0 sm:$0xff] }
  0x4e   :  { %1064 = vmatpush3.bf16.msra.mxu0 %v1063_v7  ;;  %1092 = vmatprep.subr.bf16.mxu1 %v1256_v0  ;;  %v1102_v56 = vpack.c.bf16 %v366_v52, %v365_v51  ;;  %v1105_v60 = vpack.c.bf16 %v368_v59, %v367_v58  ;;  %v450_v62 = vld [vmem:[%s1659_s9] sm:$0xff]  ;;  %v451_v63 = vld [vmem:[%s1659_s9 + $0x8] sm:$0xff]  ;;  %v452_v7 = vld [vmem:[%s1659_s9 + $0x10] sm:$0xff] }
  0x4f   :  { %1065 = vmatprep.subr.bf16.mxu0 %v1256_v0  ;;  %v1108_v5 = vpack.c.bf16 %v451_v63, %v450_v62  ;;  %v453_v8 = vld [vmem:[%s1659_s9 + $0x18] sm:$0xff]  ;;  %v629_v10 = vld [vmem:[%s1663_s13] sm:$0xff]  ;;  %v630_v11 = vld [vmem:[%s1663_s13 + $0x8] sm:$0xff] }
  0x50   :  { %v1111_v9 = vpack.c.bf16 %v453_v8, %v452_v7  ;;  %v631_v12 = vld [vmem:[%s1663_s13 + $0x10] sm:$0xff]  ;;  %v1126_v13 = vpack.c.bf16 %v630_v11, %v629_v10  ;;  %v847_v16 = vld [vmem:[#allocation7] ss:$0 sm:$0xff]  ;;  %v535_v17 = vld [vmem:[%s1661_s11] sm:$0xff] }
  0x51   :  { %1094 = vmatpush3.bf16.msra.mxu1 %v1093_v38  ;;  %v536_v18 = vld [vmem:[%s1661_s11 + $0x8] sm:$0xff]  ;;  %v537_v24 = vld [vmem:[%s1661_s11 + $0x10] sm:$0xff]  ;;  %v539_v27 = vld [vmem:[%s1661_s11 + $0x20] sm:$0xff] }
  0x52   :  { %1067 = vmatpush3.bf16.msra.mxu0 %v1066_v14  ;;  %1095 = vmatprep.subr.bf16.mxu1 %v1256_v0  ;;  %v632_v14 = vld [vmem:[%s1663_s13 + $0x18] sm:$0xff]  ;;  %v1114_v22 = vpack.c.bf16 %v536_v18, %v535_v17  ;;  %v541_v30 = vld [vmem:[%s1661_s11 + $0x30] sm:$0xff]  ;;  %v715_v33 = vld [vmem:[%s1665_s15] sm:$0xff] }
  0x53   :  { %1068 = vmatprep.subr.bf16.mxu0 %v1256_v0  ;;  %v1129_v15 = vpack.c.bf16 %v632_v14, %v631_v12  ;;  %v717_v37 = vld [vmem:[%s1665_s15 + $0x10] sm:$0xff]  ;;  %v718_v38 = vld [vmem:[%s1665_s15 + $0x18] sm:$0xff]  ;;  %v719_v41 = vld [vmem:[%s1665_s15 + $0x20] sm:$0xff] }
  0x54   :  { %v1135_v40 = vpack.c.bf16 %v718_v38, %v717_v37 }
  0x56   :  { %1070 = vmatpush3.bf16.msra.mxu0 %v1069_v21 }
  0x57   :  { %1071 = vmatprep.subr.bf16.mxu0 %v1256_v0 }
  0x5a   :  { %1073 = vmatpush3.bf16.msra.mxu0 %v1072_v25  ;;  %v538_v25 = vld [vmem:[%s1661_s11 + $0x18] sm:$0xff] }
  0x5b   :  { %1074 = vmatprep.subr.bf16.mxu0 %v1256_v0  ;;  %v1117_v26 = vpack.c.bf16 %v538_v25, %v537_v24 }
  0x5e   :  { %1076 = vmatpush3.bf16.msra.mxu0 %v1075_v28  ;;  %v540_v28 = vld [vmem:[%s1661_s11 + $0x28] sm:$0xff] }
  0x5f   :  { %1077 = vmatprep.subr.bf16.mxu0 %v1256_v0  ;;  %v1120_v29 = vpack.c.bf16 %v540_v28, %v539_v27 }
  0x62   :  { %1079 = vmatpush3.bf16.msra.mxu0 %v1078_v31  ;;  %v542_v31 = vld [vmem:[%s1661_s11 + $0x38] sm:$0xff] }
  0x63   :  { %1080 = vmatprep.subr.bf16.mxu0 %v1256_v0  ;;  %v1123_v32 = vpack.c.bf16 %v542_v31, %v541_v30 }
  0x66   :  { %1082 = vmatpush3.bf16.msra.mxu0 %v1081_v34  ;;  %v716_v34 = vld [vmem:[%s1665_s15 + $0x8] sm:$0xff] }
  0x67   :  { %1125 = vmatprep.subr.bf16.mxu0 %v1256_v0  ;;  %v1132_v36 = vpack.c.bf16 %v716_v34, %v715_v33 }
  0x69   :  { %956 = vmatmul.mubr.f32.vlgmr.msra.gmra.mrb[0].mxu0 %v1474_v35 }
  0x6a   :  { %1037 = vmatprep.mubr.msk.f32.mxu0 %vm1257_vm0, %v1258_v1  ;;  %1127 = vmatpush3.bf16.msra.mxu0 %v1126_v13 }
  0x6b   :  { %1128 = vmatprep.subr.bf16.mxu0 %v1256_v0 }
  0x6e   :  { %1130 = vmatpush3.bf16.msra.mxu0 %v1129_v15 }
  0x6f   :  { %1131 = vmatprep.subr.bf16.mxu0 %v1256_v0 }
 0x13c   :  { %v184_v42 = vpop.f32.mrb[0].mxu0 }
 0x13d   :  { %v185_v43 = vadd.f32 %v842_v39, %v184_v42  ;;  %v957_v44 = vpop.f32.mrb[1].mxu0  ;;  %v720_v42 = vld [vmem:[%s1665_s15 + $0x28] sm:$0xff] }
 0x13e   :  { %v722_v44 = vld [vmem:[%s1665_s15 + $0x38] sm:$0xff] }
 0x13f   :  { %v188_v46 = vmax.f32 %v185_v43, 0.0  ;;  %v1138_v43 = vpack.c.bf16 %v720_v42, %v719_v41 }
 0x141   :  { %975 = vmatmul.mubr.msk.f32.vlgmr.msra.gmra.mrb[0].mxu1 %vm204_vm1, %v188_v46  ;;  %v849_v46 = vld [vmem:[%s1660_s10] ss:$0 sm:$0xff] }
 0x142   :  { %1097 = vmatpush3.bf16.msra.mxu1 %v1096_v45  ;;  %985 = vmatprep.mubr.msk.f32.mxu1 %vm1257_vm0, %v1258_v1 }
 0x143   :  { %1098 = vmatprep.subr.bf16.mxu1 %v1256_v0 }
 0x146   :  { %1100 = vmatpush3.bf16.msra.mxu1 %v1099_v49 }
 0x147   :  { %1101 = vmatprep.subr.bf16.mxu1 %v1256_v0 }
 0x214   :  { %v274_v53 = vpop.f32.mrb[0].mxu1 }
 0x215   :  { %v275_v54 = vadd.f32 %v843_v50, %v274_v53  ;;  %v976_v55 = vpop.f32.mrb[1].mxu1 }
 0x217   :  { %v278_v57 = vmax.f32 %v275_v54, 0.0 }
 0x219   :  { %986 = vmatmul.mubr.msk.f32.vlgmr.msra.gmra.mrb[2].mxu1 %vm290_vm2, %v278_v57  ;;  %v851_v57 = vld [vmem:[%s1662_s12] ss:$0 sm:$0xff]  ;;  %s1260_s12 = smov [#allocation8]  }
 0x21a   :  { %1103 = vmatpush3.bf16.msra.mxu1 %v1102_v56  ;;  %996 = vmatprep.mubr.msk.f32.mxu1 %vm1257_vm0, %v1258_v1 }
 0x21b   :  { %1104 = vmatprep.subr.bf16.mxu1 %v1256_v0 }
 0x21e   :  { %1106 = vmatpush3.bf16.msra.mxu1 %v1105_v60  ;;  %v856_v60 = vld [vmem:[%s1666_s16] ss:$0 sm:$0xff] }
 0x21f   :  { %1107 = vmatprep.subr.bf16.mxu1 %v1256_v0 }
 0x2ec   :  { %v360_v2 = vpop.f32.mrb[2].mxu1 }
 0x2ed   :  { %v361_v3 = vadd.f32 %v845_v61, %v360_v2  ;;  %v987_v4 = vpop.f32.mrb[3].mxu1 }
 0x2ef   :  { %v364_v6 = vmax.f32 %v361_v3, 0.0 }
 0x2f1   :  { %819 = vst.msk [vmem:[#allocation8] sm:$0xff] %vm290_vm2, %v364_v6  ;;  %997 = vmatmul.mubr.msk.f32.vlgmr.msra.gmra.mrb[4].mxu1 %vm290_vm2, %v364_v6 }
 0x2f2   :  { %1109 = vmatpush3.bf16.msra.mxu1 %v1108_v5  ;;  %1007 = vmatprep.mubr.msk.f32.mxu1 %vm1257_vm0, %v1258_v1 }
 0x2f3   :  { %1110 = vmatprep.subr.bf16.mxu1 %v1256_v0 }
 0x2f6   :  { %1112 = vmatpush3.bf16.msra.mxu1 %v1111_v9 }
 0x2f7   :  { %1113 = vmatprep.subr.bf16.mxu1 %v1256_v0 }
 0x3c4   :  { %v445_v19 = vpop.f32.mrb[4].mxu1 }
 0x3c5   :  { %v446_v20 = vadd.f32 %v847_v16, %v445_v19  ;;  %v998_v21 = vpop.f32.mrb[5].mxu1 }
 0x3c7   :  { %v449_v23 = vmax.f32 %v446_v20, 0.0 }
 0x3c9   :  { %640 = vrot.lane.b32.xlu0 %v449_v23, %s1259_s6  ;;  %1008 = vmatmul.mubr.msk.f32.vlgmr.msra.gmra.mrb[6].mxu1 %vm290_vm2, %v449_v23 }
 0x3ca   :  { %1115 = vmatpush3.bf16.msra.mxu1 %v1114_v22  ;;  %1026 = vmatprep.mubr.msk.f32.mxu1 %vm1257_vm0, %v1258_v1 }
 0x3cb   :  { %1116 = vmatprep.subr.bf16.mxu1 %v1256_v0 }
 0x3ce   :  { %1118 = vmatpush3.bf16.msra.mxu1 %v1117_v26 }
 0x3cf   :  { %1119 = vmatprep.subr.bf16.mxu1 %v1256_v0 }
 0x3d2   :  { %1121 = vmatpush3.bf16.msra.mxu1 %v1120_v29 }
 0x3d3   :  { %1122 = vmatprep.subr.bf16.mxu1 %v1256_v0 }
 0x3d6   :  { %1124 = vmatpush3.bf16.msra.mxu1 %v1123_v32 }
 0x43b   :  { %v641_v39 = vpop.permute.xlu0 %640 }
 0x43c   :  { %1038 = vmatmul.mubr.msk.f32.vlgmr.msra.gmra.mrb[2].mxu0 %vm290_vm2, %v641_v39 }
 0x43d   :  { %1133 = vmatpush3.bf16.msra.mxu0 %v1132_v36  ;;  %1056 = vmatprep.mubr.msk.f32.mxu0 %vm1257_vm0, %v1258_v1  ;;  %v721_v1 = vld [vmem:[%s1665_s15 + $0x30] sm:$0xff] }
 0x43e   :  { %1134 = vmatprep.subr.bf16.mxu0 %v1256_v0  ;;  %v1141_v45 = vpack.c.bf16 %v722_v44, %v721_v1 }
 0x441   :  { %1136 = vmatpush3.bf16.msra.mxu0 %v1135_v40 }
 0x442   :  { %1137 = vmatprep.subr.bf16.mxu0 %v1256_v0 }
 0x445   :  { %1139 = vmatpush3.bf16.msra.mxu0 %v1138_v43 }
 0x446   :  { %1140 = vmatprep.subr.bf16.mxu0 %v1256_v0  ;;  %v854_v0 = vld [vmem:[%s1664_s14] ss:$0 sm:$0xff]  ;;  %s828_s14 = sshll.u32 %s1260_s12, 4  ;;  %s829_s14 = int_to_ptr.vmem [resolvable:$true] %s828_s14 }
 0x447   :  { %s1225_s16 = scalar_lea.vmem %s829_s14, 128  ;;  %p1230_p11 = scmp.lt.s32.totalorder %s829_s14, %s829_s14 }
 0x448   :  { %p1226_p10 = scmp.ne.s32.totalorder %s829_s14, %s1225_s16  ;;  %p1231_p12 = scmp.lt.s32.totalorder %s1225_s16, %s1225_s16 }
 0x449   :  { %1142 = vmatpush3.bf16.msra.mxu0 %v1141_v45 }
 0x44a   :  { %p1232_p13 = por %p1231_p12, %p1230_p11 }
 0x44c   :  { %p1233_p0 = pnand %p1232_p13, %p1226_p10 }
 0x49c   :  { %v530_v47 = vpop.f32.mrb[6].mxu1 }
 0x49d   :  { %v531_v48 = vadd.f32 %v849_v46, %v530_v47  ;;  %v1009_v49 = vpop.f32.mrb[7].mxu1 }
 0x49f   :  { %v534_v50 = vmax.f32 %v531_v48, 0.0 }
 0x4a1   :  { %1027 = vmatmul.mubr.msk.f32.vlgmr.msra.gmra.mrb[8].mxu1 %vm204_vm1, %v534_v50 }
 0x50f   :  { %v710_v51 = vpop.f32.mrb[2].mxu0 }
 0x510   :  { %v711_v52 = vadd.f32 %v854_v0, %v710_v51  ;;  %v1039_v53 = vpop.f32.mrb[3].mxu0 }
 0x512   :  { %v714_v54 = vmax.f32 %v711_v52, 0.0 }
 0x514   :  { %1057 = vmatmul.mubr.msk.f32.vlgmr.msra.gmra.mrb[4].mxu0 %vm204_vm1, %v714_v54 }
 0x574   :  { %v619_v55 = vpop.f32.mrb[8].mxu1 }
 0x575   :  { %v1028_v56 = vpop.f32.mrb[9].mxu1  ;;  %v620_v58 = vadd.f32 %v851_v57, %v619_v55 }
 0x577   :  { %v853_v59 = vmul.f32 -1.442695, %v620_v58 }
 0x579   :  { %1151 = vpow2.f32 %v853_v59 }
 0x583   :  { %v1152_v3 = vpop.eup %1151 }
 0x584   :  { %v626_v4 = vadd.f32 1.0, %v1152_v3 }
 0x5e7   :  { %v799_v61 = vpop.f32.mrb[4].mxu0 }
 0x5e8   :  { %v800_v62 = vadd.f32 %v856_v60, %v799_v61  ;;  %v1058_v63 = vpop.f32.mrb[5].mxu0 }
 0x5ea   :  { %v858_v2 = vmul.f32 -1.442695, %v800_v62 }
 0x5ec   :  { %1153 = vpow2.f32 %v858_v2 }
 0x5ed   :  { %1155 = vrcp.f32 %v626_v4 }
 0x5f6   :  { %v1154_v5 = vpop.eup %1153 }
 0x5f7   :  { %v806_v6 = vadd.f32 1.0, %v1154_v5  ;;  %v1156_v7 = vpop.eup %1155 }
 0x5f8   :  { %v809_v8 = vsub.f32 %v1474_v35, %v1156_v7 }
 0x5f9   :  { %1157 = vrcp.f32 %v806_v6 }
 0x5fa   :  { %v811_v11 = vmul.f32 0.5, %v809_v8 }
 0x5fc   :  { %v812_v13 = vmul.f32 %v811_v11, %v809_v8 }
 0x603   :  { %v1158_v9 = vpop.eup %1157 }
 0x604   :  { %v810_v10 = vsub.f32 %v1474_v35, %v1158_v9 }
 0x606   :  { %v813_v12 = vmul.f32 0.5, %v810_v10 }
 0x608   :  { %v814_v14 = vmul.f32 %v813_v12, %v810_v10 }
 0x60a   :  { %v815_v15 = vadd.f32 %v814_v14, %v812_v13 }
 0x60c   :  { %816 = vadd.xlane.f32.xlu0 %v815_v15 }
 0x60d   :  { %1236 = shalt.err (!%p1233_p0)
}
 0x60e   :  { %s1237_s29 = scalar_lea.hbm %s1667_s17, 128 }
 0x60f   :  { %p1238_p1 = scmp.ne.s32.totalorder %s1667_s17, %s1237_s29  ;;  %p1241_p2 = scmp.lt.u32.totalorder %s1237_s29, %s1667_s17 }
 0x611   :  { %p1243_p3 = pnand %p1241_p2, %p1238_p1 }
 0x613   :  { %1246 = shalt.err (!%p1243_p3)
}
 0x614   :  { %831 = dma.vmem_to_hbm [thread:$0]  %s829_s14, 128, %s1667_s17, [#allocation4]   ;;  %vm820_vm3 = vcmask 7168  }
 0x699   :  { %v817_v35 = vpop.xlane.xlu0 %816 }
 0x69a   :  { %v818_v16 = vmul.f32 0.0078125, %v817_v35 }
 0x69c   :  { %821 = vst.msk [vmem:[%s1668_s18] sm:$0xff] %vm820_vm3, %v818_v16 }
 0x69d   :  { %1251 = dma.done.wait [#allocation4], 128  }
 0x69e   :  { %1252 = vsyncadd [#allocation4], 4294967168 }
 0x69f   :  { %839 = vsyncpa [#allocation3], 1 }
 0x6a0   :  { %840 = vsyncpa [#allocation6], 1 }
 0x6a1   :  { %841 = vsyncpa [#allocation4], 1 }

</bundles_post_ra>
